<compile_context>
chip_gen: v5e
topology: v5e:2x2
jax: 0.10.0
libtpu: 0.0.40
codegen_flags: <defaults>
</compile_context>

<pallas_src>
import jax
import jax.numpy as jnp
import numpy as np
from jax import lax
from jax.experimental import pallas as pl
from jax.experimental.pallas import tpu as pltpu


LANE = 128      # TPU lane width: output feature dim padded to a multiple of this
SUBLANE = 8     # row / graph padding granularity


def _round_up(x, m):
    return ((x + m - 1) // m) * m


# ---------------------------------------------------------------------------
# Kernels
# ---------------------------------------------------------------------------

def _node_pool_kernel(x_ref, lap_ref, batch_ref, wh_ref, wp_ref,
                      acc_ref, cnt_ref):
    """Fused node embedding + lap-PE + per-graph segment-sum pooling.

    Each grid step processes TILE_N nodes:
        h = x_blk @ Wh + lap_blk @ Wp                 (two small-K MXU dots)
        onehot = (batch_blk == iota(B_pad))           (TILE_N, B_pad)
        acc += onehot^T @ h                           (MXU, contraction = TILE_N)
        cnt += column-sum(onehot)
    acc / cnt are per-core resident output blocks (accumulator pattern); the
    mean, bias add and slicing happen in the wrapper epilogue.
    """
    i = pl.program_id(1)

    @pl.when(i == 0)
    def _init():
        acc_ref[...] = jnp.zeros_like(acc_ref)
        cnt_ref[...] = jnp.zeros_like(cnt_ref)

    # Linear + lap-PE: operands already in compute dtype; accumulate in f32.
    h = (jnp.dot(x_ref[...], wh_ref[...], preferred_element_type=jnp.float32)
         + jnp.dot(lap_ref[...], wp_ref[...], preferred_element_type=jnp.float32))

    tile_n = x_ref.shape[0]
    b_pad = acc_ref.shape[0]

    # One-hot segment matrix; padded rows carry batch id == -1 -> match nothing.
    onehot = (batch_ref[...] ==
              lax.broadcasted_iota(jnp.int32, (tile_n, b_pad), 1)
              ).astype(jnp.float32)                                   # (TILE_N, B_pad)

    # Segment sum on the MXU (contract over the row tile).
    acc_ref[...] += lax.dot_general(
        onehot, h, (((0,), (0,)), ((), ())),
        preferred_element_type=jnp.float32)                           # (B_pad, H_PAD)

    # Narrow per-graph node counts (lane axis = graphs).
    cnt_ref[...] += jnp.sum(onehot, axis=0, keepdims=True)            # (1, B_pad)


def _edge_kernel(e_ref, w_ref, b_ref, o_ref):
    """data.edge_attr = linear_e(edge_attr):  o = e @ We + be  (row-tiled)."""
    o = jnp.dot(e_ref[...], w_ref[...], preferred_element_type=jnp.float32)
    o_ref[...] = (o + b_ref[...]).astype(o_ref.dtype)


# ---------------------------------------------------------------------------
# pallas_call wrappers
# ---------------------------------------------------------------------------

def _fused_node_pool(x, lap, batch2d, wh, wp, *, num_cores, steps_per_core,
                     tile_n, b_pad, h_pad):
    d_vocab = x.shape[1]
    d_pos = lap.shape[1]

    def row_map(c, i):
        return (c * steps_per_core + i, 0)

    return pl.pallas_call(
        _node_pool_kernel,
        out_shape=(
            jax.ShapeDtypeStruct((num_cores, b_pad, h_pad), jnp.float32),  # partial acc
            jax.ShapeDtypeStruct((num_cores, 1, b_pad), jnp.float32),      # partial cnt
        ),
        grid_spec=pltpu.PrefetchScalarGridSpec(
            num_scalar_prefetch=0,
            grid=(num_cores, steps_per_core),
            in_specs=[
                pl.BlockSpec((tile_n, d_vocab), row_map),        # x rows
                pl.BlockSpec((tile_n, d_pos), row_map),          # lap_enc rows
                pl.BlockSpec((tile_n, 1), row_map),              # batch ids
                pl.BlockSpec((d_vocab, h_pad), lambda c, i: (0, 0)),   # Wh (resident)
                pl.BlockSpec((d_pos, h_pad), lambda c, i: (0, 0)),     # Wp (resident)
            ],
            out_specs=(
                pl.BlockSpec((None, b_pad, h_pad), lambda c, i: (c, 0, 0)),
                pl.BlockSpec((None, 1, b_pad), lambda c, i: (c, 0, 0)),
            ),
        ),
        compiler_params=pltpu.CompilerParams(
            # Core axis is independent (per-core partial accumulators) -> parallel;
            # the row-tile axis carries the accumulator -> arbitrary.
            dimension_semantics=("parallel", "arbitrary"),
        ),
    )(x, lap, batch2d, wh, wp)


def _edge_embed(e_attr, we, be, *, tile_e, out_dtype):
    e_pad, d_edge = e_attr.shape
    h_pad = we.shape[1]
    return pl.pallas_call(
        _edge_kernel,
        out_shape=jax.ShapeDtypeStruct((e_pad, h_pad), out_dtype),
        grid_spec=pltpu.PrefetchScalarGridSpec(
            num_scalar_prefetch=0,
            grid=(e_pad // tile_e,),
            in_specs=[
                pl.BlockSpec((tile_e, d_edge), lambda i: (i, 0)),
                pl.BlockSpec((d_edge, h_pad), lambda i: (0, 0)),
                pl.BlockSpec((1, h_pad), lambda i: (0, 0)),
            ],
            out_specs=pl.BlockSpec((tile_e, h_pad), lambda i: (i, 0)),
        ),
        compiler_params=pltpu.CompilerParams(
            # Independent rows: lets v7x split edge blocks across its 2 TensorCores.
            dimension_semantics=("parallel",),
        ),
    )(e_attr, we, be)


# ---------------------------------------------------------------------------
# Model: parameters + forward
# ---------------------------------------------------------------------------

def init_params(key, d_vocab, d_edge, pos_enc_dim, hidden_dim):
    ks = jax.random.split(key, 6)
    scale = 0.1
    # stored as (in, out) so kernels compute x @ W + b  (== PyTorch x @ W.T + b)
    return {
        "wh": scale * jax.random.normal(ks[0], (d_vocab, hidden_dim), jnp.float32),
        "bh": scale * jax.random.normal(ks[1], (1, hidden_dim), jnp.float32),
        "we": scale * jax.random.normal(ks[2], (d_edge, hidden_dim), jnp.float32),
        "be": scale * jax.random.normal(ks[3], (1, hidden_dim), jnp.float32),
        "wp": scale * jax.random.normal(ks[4], (pos_enc_dim, hidden_dim), jnp.float32),
        "bp": scale * jax.random.normal(ks[5], (1, hidden_dim), jnp.float32),
    }


def drug3d_forward(params, x, lap_enc, edge_attr, batch, num_graphs,
                   *, tile_n=None, tile_e=None, num_cores=1,
                   compute_dtype=jnp.float32):
    """Returns (pooled (num_graphs, hidden), edge_emb (E_pad, H_pad) in compute dtype).

    The edge embedding is returned lane-padded (rows padded to the edge tile,
    features padded to a multiple of 128) so no extra host-side slicing pass is
    needed before the downstream GPS layers; slice if the unpadded view is
    required.
    """
    n = x.shape[0]
    e_rows = edge_attr.shape[0]
    hidden = params["wh"].shape[1]
    h_pad = _round_up(max(hidden, LANE), LANE)            # lane-dense feature width
    b_pad = _round_up(max(num_graphs, SUBLANE), SUBLANE)  # sublane-aligned graph count

    # Big default row tiles: per-step bytes are small, so per-grid-step overhead
    # dominates at small tiles; double-buffered footprint stays < ~2 MiB.
    if tile_n is None:
        tile_n = min(2048, _round_up(n, SUBLANE))
    if tile_e is None:
        tile_e = min(2048, _round_up(e_rows, SUBLANE))

    # --- node path: linear_h + lap-PE + global_mean_pool (one fused kernel) ---
    n_pad = _round_up(n, tile_n * num_cores)
    steps_per_core = n_pad // (tile_n * num_cores)

    wh = jnp.pad(params["wh"], ((0, 0), (0, h_pad - hidden))).astype(compute_dtype)
    wp = jnp.pad(params["wp"], ((0, 0), (0, h_pad - hidden))).astype(compute_dtype)
    x_p = jnp.pad(x.astype(compute_dtype), ((0, n_pad - n), (0, 0)))
    lap_p = jnp.pad(lap_enc.astype(compute_dtype), ((0, n_pad - n), (0, 0)))
    batch2d = jnp.pad(batch.astype(jnp.int32).reshape(n, 1),
                      ((0, n_pad - n), (0, 0)),
                      constant_values=-1)                  # padded rows match no graph

    # in_feat_dropout: eval mode -> identity.
    acc, cnt = _fused_node_pool(
        x_p, lap_p, batch2d, wh, wp,
        num_cores=num_cores, steps_per_core=steps_per_core,
        tile_n=tile_n, b_pad=b_pad, h_pad=h_pad)

    # Tiny XLA epilogue: combine per-core partials, divide, add bias, slice.
    acc_sum = jnp.sum(acc, axis=0)[:num_graphs, :hidden]        # (B, hidden) f32
    counts = jnp.sum(cnt, axis=(0, 1))[:num_graphs]             # (B,) f32
    bias = (params["bh"] + params["bp"])[0, :hidden]            # (hidden,)
    mean = acc_sum / jnp.maximum(counts, 1.0)[:, None]
    # Bias is constant per node so it's added once after the mean; empty graphs
    # pool to 0 (matching global_mean_pool on h-with-bias-inside).
    pooled = jnp.where((counts > 0.0)[:, None], mean + bias[None, :], 0.0)

    # --- edge path: data.edge_attr = linear_e(edge_attr) ----------------------
    e_pad_rows = _round_up(e_rows, tile_e)
    e_in = jnp.pad(edge_attr.astype(compute_dtype),
                   ((0, e_pad_rows - e_rows), (0, 0)))
    we = jnp.pad(params["we"], ((0, 0), (0, h_pad - hidden))).astype(compute_dtype)
    be = jnp.pad(params["be"], ((0, 0), (0, h_pad - hidden)))   # bias add stays f32
    e_emb = _edge_embed(e_in, we, be, tile_e=tile_e, out_dtype=compute_dtype)

    # TODO(synk): gps_layer1.GPSLayer source unavailable; the 3 GPS layers are
    # treated as identity on node features (e_emb would be consumed there).
    return pooled, e_emb


# ---------------------------------------------------------------------------
# Pure-JAX reference (for correctness check)
# ---------------------------------------------------------------------------

def reference_forward(params, x, lap_enc, edge_attr, batch, num_graphs):
    h = x @ params["wh"] + params["bh"] + lap_enc @ params["wp"] + params["bp"]
    e = edge_attr @ params["we"] + params["be"]
    onehot = jax.nn.one_hot(batch, num_graphs, dtype=jnp.float32).T      # (B, N)
    counts = jnp.maximum(onehot.sum(axis=1, keepdims=True), 1.0)
    return (onehot @ h) / counts, e


if __name__ == "__main__":
    # Small shapes consistent with the module's forward.
    d_vocab, d_edge, pos_enc_dim, hidden_dim = 21, 16, 8, 32
    n_nodes, n_edges, num_graphs = 16, 24, 2

    key = jax.random.PRNGKey(0)
    kx, klap, ke, kp = jax.random.split(key, 4)

    x = jax.random.normal(kx, (n_nodes, d_vocab), jnp.float32)               # data.x
    lap_enc = jax.random.normal(klap, (n_nodes, pos_enc_dim), jnp.float32)   # data.lap_enc
    edge_attr = jax.random.normal(ke, (n_edges, d_edge), jnp.float32)        # data.edge_attr
    batch = jnp.concatenate([jnp.zeros(8, jnp.int32), jnp.ones(8, jnp.int32)])  # data.batch

    params = init_params(kp, d_vocab, d_edge, pos_enc_dim, hidden_dim)
    pooled_ref, e_ref = reference_forward(params, x, lap_enc, edge_attr, batch, num_graphs)

    # f32 path, single-core grid, tile_n/tile_e = 8 so the accumulation axis has >1 step.
    pooled, e_emb = drug3d_forward(params, x, lap_enc, edge_attr, batch, num_graphs,
                                   tile_n=8, tile_e=8, num_cores=1,
                                   compute_dtype=jnp.float32)
    pooled = jax.block_until_ready(pooled)
    e_emb = jax.block_until_ready(e_emb)
    np.testing.assert_allclose(np.asarray(pooled), np.asarray(pooled_ref),
                               rtol=1e-5, atol=1e-5)
    np.testing.assert_allclose(np.asarray(e_emb[:n_edges, :hidden_dim]),
                               np.asarray(e_ref), rtol=1e-5, atol=1e-5)

    # f32 path with the 2-way core split of the node row axis (v7x megacore path).
    pooled2, _ = drug3d_forward(params, x, lap_enc, edge_attr, batch, num_graphs,
                                tile_n=8, tile_e=8, num_cores=2,
                                compute_dtype=jnp.float32)
    pooled2 = jax.block_until_ready(pooled2)
    np.testing.assert_allclose(np.asarray(pooled2), np.asarray(pooled_ref),
                               rtol=1e-5, atol=1e-5)

    # bf16 MXU compute path (streamed operands + weights pre-cast in wrapper,
    # f32 accumulation) — loose tolerance.  Tiles are 16 (bf16 sublane packing).
    pooled_bf, e_bf = drug3d_forward(params, x, lap_enc, edge_attr, batch, num_graphs,
                                     tile_n=16, tile_e=16, num_cores=1,
                                     compute_dtype=jnp.bfloat16)
    pooled_bf = jax.block_until_ready(pooled_bf)
    e_bf = jax.block_until_ready(e_bf)
    np.testing.assert_allclose(np.asarray(pooled_bf), np.asarray(pooled_ref),
                               rtol=5e-2, atol=5e-2)
    np.testing.assert_allclose(
        np.asarray(jnp.asarray(e_bf[:n_edges, :hidden_dim], jnp.float32)),
        np.asarray(e_ref), rtol=5e-2, atol=5e-2)

    print("KERNEL_OK")
</pallas_src>

<mosaic_0001>
module attributes {stable_mosaic.version = 11 : i64} {
  func.func @_node_pool_kernel(%arg0: i32, %arg1: i32, %arg2: memref<8x21xf32, #tpu.memory_space<vmem>>, %arg3: memref<8x8xf32, #tpu.memory_space<vmem>>, %arg4: memref<8x1xi32, #tpu.memory_space<vmem>>, %arg5: memref<21x128xf32, #tpu.memory_space<vmem>>, %arg6: memref<8x128xf32, #tpu.memory_space<vmem>>, %arg7: memref<1x8x128xf32, #tpu.memory_space<vmem>>, %arg8: memref<1x1x8xf32, #tpu.memory_space<vmem>>) attributes {dimension_semantics = [#tpu.dimension_semantics<parallel>, #tpu.dimension_semantics<arbitrary>], iteration_bounds = array<i64: 1, 2>, scalar_prefetch = 0 : i64, scratch_operands = 0 : i64, tpu.core_type = #tpu.core_type<tc>, window_params = [{transform_indices = @transform_0, window_bounds = array<i64: 8, 21>}, {transform_indices = @transform_1, window_bounds = array<i64: 8, 8>}, {transform_indices = @transform_2, window_bounds = array<i64: 8, 1>}, {pipeline_mode = #tpu.pipeline_mode<synchronous>, transform_indices = @transform_3, window_bounds = array<i64: 21, 128>}, {pipeline_mode = #tpu.pipeline_mode<synchronous>, transform_indices = @transform_4, window_bounds = array<i64: 8, 128>}, {transform_indices = @transform_5, window_bounds = array<i64: 1, 8, 128>}, {transform_indices = @transform_6, window_bounds = array<i64: 1, 1, 8>}]} {
    %c0_i32 = arith.constant 0 : i32
    %0 = arith.cmpi eq, %arg1, %c0_i32 : i32
    %1 = arith.extui %0 : i1 to i32
    %c0_i32_0 = arith.constant 0 : i32
    %2 = arith.cmpi ne, %1, %c0_i32_0 : i32
    scf.if %2 {
      %cst_25 = arith.constant 0.000000e+00 : f32
      %31 = vector.broadcast %cst_25 : f32 to vector<8x128xf32>
      %c0_26 = arith.constant 0 : index
      %c0_27 = arith.constant 0 : index
      %c0_28 = arith.constant 0 : index
      %32 = vector.load %arg7[%c0_26, %c0_27, %c0_28] : memref<1x8x128xf32, #tpu.memory_space<vmem>>, vector<1x8x128xf32>
      %33 = vector.shape_cast %32 : vector<1x8x128xf32> to vector<8x128xf32>
      %34 = vector.shape_cast %31 : vector<8x128xf32> to vector<1x8x128xf32>
      tpu.vector_store %arg7[%c0_26, %c0_27, %c0_28], %34 {strides = array<i32>} : memref<1x8x128xf32, #tpu.memory_space<vmem>>, vector<1x8x128xf32>,
      %cst_29 = arith.constant 0.000000e+00 : f32
      %35 = vector.broadcast %cst_29 : f32 to vector<1x8xf32>
      %c0_30 = arith.constant 0 : index
      %c0_31 = arith.constant 0 : index
      %c0_32 = arith.constant 0 : index
      %36 = vector.load %arg8[%c0_30, %c0_31, %c0_32] : memref<1x1x8xf32, #tpu.memory_space<vmem>>, vector<1x1x8xf32>
      %37 = vector.shape_cast %36 : vector<1x1x8xf32> to vector<1x8xf32>
      %38 = vector.shape_cast %35 : vector<1x8xf32> to vector<1x1x8xf32>
      tpu.vector_store %arg8[%c0_30, %c0_31, %c0_32], %38 {strides = array<i32>} : memref<1x1x8xf32, #tpu.memory_space<vmem>>, vector<1x1x8xf32>,
    } else {
    }
    %c0 = arith.constant 0 : index
    %c0_1 = arith.constant 0 : index
    %3 = vector.load %arg2[%c0, %c0_1] : memref<8x21xf32, #tpu.memory_space<vmem>>, vector<8x21xf32>
    %c0_2 = arith.constant 0 : index
    %c0_3 = arith.constant 0 : index
    %4 = vector.load %arg5[%c0_2, %c0_3] : memref<21x128xf32, #tpu.memory_space<vmem>>, vector<21x128xf32>
    %cst = arith.constant dense<0.000000e+00> : vector<8x128xf32>
    %5 = tpu.matmul %3, %4, %cst {dimension_numbers = #tpu.dot_dimension_numbers<[1], [0], [0], [1], [0, 0, 1, 1], [], []>} : vector<8x21xf32>, vector<21x128xf32>, vector<8x128xf32> -> vector<8x128xf32>
    %c0_4 = arith.constant 0 : index
    %c0_5 = arith.constant 0 : index
    %6 = vector.load %arg3[%c0_4, %c0_5] : memref<8x8xf32, #tpu.memory_space<vmem>>, vector<8x8xf32>
    %c0_6 = arith.constant 0 : index
    %c0_7 = arith.constant 0 : index
    %7 = vector.load %arg6[%c0_6, %c0_7] : memref<8x128xf32, #tpu.memory_space<vmem>>, vector<8x128xf32>
    %cst_8 = arith.constant dense<0.000000e+00> : vector<8x128xf32>
    %8 = tpu.matmul %6, %7, %cst_8 {dimension_numbers = #tpu.dot_dimension_numbers<[1], [0], [0], [1], [0, 0, 1, 1], [], []>} : vector<8x8xf32>, vector<8x128xf32>, vector<8x128xf32> -> vector<8x128xf32>
    %9 = arith.addf %5, %8 : vector<8x128xf32>
    %c0_9 = arith.constant 0 : index
    %c0_10 = arith.constant 0 : index
    %10 = vector.load %arg4[%c0_9, %c0_10] : memref<8x1xi32, #tpu.memory_space<vmem>>, vector<8x1xi32>
    %11 = tpu.iota {dimensions = array<i32: 1>} : vector<8x8xi32>
    %12 = vector.broadcast %10 : vector<8x1xi32> to vector<8x8xi32>
    %13 = arith.cmpi eq, %12, %11 : vector<8x8xi32>
    %14 = arith.extui %13 : vector<8x8xi1> to vector<8x8xi32>
    %15 = arith.sitofp %14 : vector<8x8xi32> to vector<8x8xf32>
    %c0_11 = arith.constant 0 : index
    %c0_12 = arith.constant 0 : index
    %c0_13 = arith.constant 0 : index
    %16 = vector.load %arg7[%c0_11, %c0_12, %c0_13] : memref<1x8x128xf32, #tpu.memory_space<vmem>>, vector<1x8x128xf32>
    %17 = vector.shape_cast %16 : vector<1x8x128xf32> to vector<8x128xf32>
    %cst_14 = arith.constant dense<0.000000e+00> : vector<8x128xf32>
    %18 = tpu.matmul %15, %9, %cst_14 {dimension_numbers = #tpu.dot_dimension_numbers<[0], [0], [1], [1], [0, 1, 1, 1], [], []>} : vector<8x8xf32>, vector<8x128xf32>, vector<8x128xf32> -> vector<8x128xf32>
    %19 = arith.addf %17, %18 : vector<8x128xf32>
    %c0_15 = arith.constant 0 : index
    %c0_16 = arith.constant 0 : index
    %c0_17 = arith.constant 0 : index
    %20 = vector.load %arg7[%c0_15, %c0_16, %c0_17] : memref<1x8x128xf32, #tpu.memory_space<vmem>>, vector<1x8x128xf32>
    %21 = vector.shape_cast %20 : vector<1x8x128xf32> to vector<8x128xf32>
    %22 = vector.shape_cast %19 : vector<8x128xf32> to vector<1x8x128xf32>
    tpu.vector_store %arg7[%c0_15, %c0_16, %c0_17], %22 {strides = array<i32>} : memref<1x8x128xf32, #tpu.memory_space<vmem>>, vector<1x8x128xf32>,
    %c0_18 = arith.constant 0 : index
    %c0_19 = arith.constant 0 : index
    %c0_20 = arith.constant 0 : index
    %23 = vector.load %arg8[%c0_18, %c0_19, %c0_20] : memref<1x1x8xf32, #tpu.memory_space<vmem>>, vector<1x1x8xf32>
    %24 = vector.shape_cast %23 : vector<1x1x8xf32> to vector<1x8xf32>
    %cst_21 = arith.constant dense<0.000000e+00> : vector<8xf32>
    %25 = vector.multi_reduction <add>, %15, %cst_21 [0] : vector<8x8xf32> to vector<8xf32>
    %26 = vector.shape_cast %25 : vector<8xf32> to vector<1x8xf32>
    %27 = arith.addf %24, %26 : vector<1x8xf32>
    %c0_22 = arith.constant 0 : index
    %c0_23 = arith.constant 0 : index
    %c0_24 = arith.constant 0 : index
    %28 = vector.load %arg8[%c0_22, %c0_23, %c0_24] : memref<1x1x8xf32, #tpu.memory_space<vmem>>, vector<1x1x8xf32>
    %29 = vector.shape_cast %28 : vector<1x1x8xf32> to vector<1x8xf32>
    %30 = vector.shape_cast %27 : vector<1x8xf32> to vector<1x1x8xf32>
    tpu.vector_store %arg8[%c0_22, %c0_23, %c0_24], %30 {strides = array<i32>} : memref<1x1x8xf32, #tpu.memory_space<vmem>>, vector<1x1x8xf32>,
    return
  }
  func.func @transform_0(%arg0: i32, %arg1: i32) -> (i32, i32) {
    %c2_i32 = arith.constant 2 : i32
    %0 = arith.muli %arg0, %c2_i32 : i32
    %1 = arith.addi %0, %arg1 : i32
    %c0_i32 = arith.constant 0 : i32
    %c0_i32_0 = arith.constant 0 : i32
    return %1, %c0_i32 : i32, i32
  }
  func.func @transform_1(%arg0: i32, %arg1: i32) -> (i32, i32) {
    %c2_i32 = arith.constant 2 : i32
    %0 = arith.muli %arg0, %c2_i32 : i32
    %1 = arith.addi %0, %arg1 : i32
    %c0_i32 = arith.constant 0 : i32
    %c0_i32_0 = arith.constant 0 : i32
    return %1, %c0_i32 : i32, i32
  }
  func.func @transform_2(%arg0: i32, %arg1: i32) -> (i32, i32) {
    %c2_i32 = arith.constant 2 : i32
    %0 = arith.muli %arg0, %c2_i32 : i32
    %1 = arith.addi %0, %arg1 : i32
    %c0_i32 = arith.constant 0 : i32
    %c0_i32_0 = arith.constant 0 : i32
    return %1, %c0_i32 : i32, i32
  }
  func.func @transform_3(%arg0: i32, %arg1: i32) -> (i32, i32) {
    %c0_i32 = arith.constant 0 : i32
    %c0_i32_0 = arith.constant 0 : i32
    %c0_i32_1 = arith.constant 0 : i32
    return %c0_i32, %c0_i32_0 : i32, i32
  }
  func.func @transform_4(%arg0: i32, %arg1: i32) -> (i32, i32) {
    %c0_i32 = arith.constant 0 : i32
    %c0_i32_0 = arith.constant 0 : i32
    %c0_i32_1 = arith.constant 0 : i32
    return %c0_i32, %c0_i32_0 : i32, i32
  }
  func.func @transform_5(%arg0: i32, %arg1: i32) -> (i32, i32, i32) {
    %c0_i32 = arith.constant 0 : i32
    %c0_i32_0 = arith.constant 0 : i32
    %c0_i32_1 = arith.constant 0 : i32
    return %arg0, %c0_i32, %c0_i32_0 : i32, i32, i32
  }
  func.func @transform_6(%arg0: i32, %arg1: i32) -> (i32, i32, i32) {
    %c0_i32 = arith.constant 0 : i32
    %c0_i32_0 = arith.constant 0 : i32
    %c0_i32_1 = arith.constant 0 : i32
    return %arg0, %c0_i32, %c0_i32_0 : i32, i32, i32
  }
}

</mosaic_0001>

<bundles_post_ra>
// kernel: tpu_custom_call.1
= control target key start
LH: loop header
LB: loop body
LE: loop exit
PB: predicated region body
PF: predicated region fallthrough
CT: control target
= control target key end

     0   :  { %12 = vsyncpa [#allocation3], 0  ;;  %s928_s0 = inlined_call_operand.vmem [shape: f32[16,21], index: 0, kind: input, shape index: {}]   ;;  %s929_s1 = inlined_call_operand.vmem [shape: f32[16,8], index: 1, kind: input, shape index: {}]   ;;  %s930_s2 = inlined_call_operand.vmem [shape: s32[16,1], index: 2, kind: input, shape index: {}]   ;;  %s931_s3 = inlined_call_operand.vmem [shape: f32[21,128], index: 3, kind: input, shape index: {}]   ;;  %s932_s4 = inlined_call_operand.hbm [shape: f32[8,128], index: 4, kind: input, shape index: {}]   ;;  %s933_s5 = inlined_call_operand.hbm [shape: f32[1,8,128], index: 5, kind: output, shape index: {0}]   ;;  %s934_s6 = inlined_call_operand.hbm [shape: f32[1,1,8], index: 6, kind: output, shape index: {1}]  }
   0x1   :  { %13 = vsyncpa [#allocation4], 0 }
   0x2   :  { %14 = vsyncpa [#allocation7], 0  ;;  %s850_s21 = smov 0   ;;  %s852_s22 = smov 0  }
   0x3   :  { %s854_s23 = smov 0  }
   0x4 LB: > { %s613_s24 = sadd.s32 4294967295, %s807_s23   ;;  %s29_s25 = sadd.s32 1, %s803_s22  ;;  %s807_s23 = sphi %s854_s23, %s20_s23   ;;  %s803_s22 = sphi %s852_s22, %s937_s22   ;;  %s799_s21 = sphi %s850_s21, %s936_s21  }
   0x5   : > { %p30_p0 = scmp.ge.s32.totalorder %s29_s25, 2  ;;  %p614_p1 = scmp.ge.s32.totalorder %s807_s23, 1 }
   0x6   : > { %p221_p2 = scmp.lt.s32.totalorder %s807_s23, 3  ;;  %p650_p4 = scmp.eq.s32.totalorder %s613_s24, 0 }
   0x7   : > { %s939_s25 = smov (%p30_p0, %s29_s25), 0  ;;  %s236_s28 = sshll.u32 %s932_s4, 4  ;;  %s237_s28 = int_to_ptr.hbm [resolvable:$true] %s236_s28 }
   0x8   : > { %p222_p3 = pnand %p614_p1, %p221_p2  ;;  %s809_s29 = smov [#allocation2]  }
   0x9   : > { %s238_s30 = sshll.u32 %s809_s29, 4  ;;  %s239_s30 = int_to_ptr.vmem [resolvable:$true] %s238_s30 }
   0xa   : > { %p646_p5 = pneg %p222_p3  ;;  %284 = sbr.rel (%p222_p3) target bundleno = 451 (0x1c3), region = 40 }
   0xc   : > { %p647_p6 = pnand %p650_p4, %p646_p5 }
   0xe   : > { %649 = dma.hbm_to_vmem [thread:$0]  (!%p647_p6), %s237_s28, 128, %s239_s30, [#allocation3]  }
   0xf   : > { %786 = dma.done.wait (%p650_p4), [#allocation3], 128  }
  0x10   : > { %788 = vsyncadd (%p650_p4), [#allocation3], 4294967168  ;;  %p325_p7 = scmp.lt.s32.totalorder %s799_s21, 1  ;;  %p622_p8 = scmp.ne.s32.totalorder %s799_s21, 0 }
  0x12   : > { %s326_s7 = scalar_select %p325_p7, %s799_s21, 1 }
  0x13   : > { %350 = sbr.rel (%p622_p8) target bundleno = 27 (0x1b), region = 48 }
  0x14   : > { %s619_s8 = sshll.u32 %s326_s7, 3 }
  0x15   : > { %s328_s11 = scalar_lea.vmem %s928_s0, %s619_s8  ;;  %s336_s14 = scalar_lea.vmem %s929_s1, %s619_s8 }
  0x16   : > { %s344_s17 = scalar_lea.vmem %s930_s2, %s619_s8 }
  0x18   : > { %vm352_vm0 = vcmask 57344   ;;  %v810_v0 = vmov 0.0  }
  0x19   : > { %351 = vst [vmem:[#allocation5] sm:$0xff] %v810_v0 }
  0x1a   : > { %353 = vst.msk [vmem:[#allocation6] sm:$0x1] %vm352_vm0, %v810_v0 }
  0x1b PF: > { %v412_v1 = vld [vmem:[%s344_s17] sm:$0xff]  ;;  %v811_v2 = vmov 0   ;;  %v357_v3 = vld [vmem:[%s931_s3 + $0x10] sm:$0x1f]  ;;  %vm388_vm1 = vcmask 1044480   ;;  %v356_v4 = vld [vmem:[%s931_s3 + $0x8] sm:$0xff]  ;;  %v413_v9 = vlaneseq }
  0x1c   : > { %686 = vset.pattern.permute.xlu0 %v811_v2  ;;  %v359_v5 = vld [vmem:[#allocation2] sm:$0xff]  ;;  %624 = vmatpush.msk.msra.mxu1 %vm388_vm1, %v357_v3  ;;  %vm360_vm2 = vcmask 64512   ;;  %vm384_vm3 = vcmask 171008   ;;  %v812_v12 = vmov 0.0   ;;  %vm488_vm5 = vcmask 57344   ;;  %p897_p9 = scmp.eq.s32.totalorder %s613_s24, 1 }
  0x1d   : > { %416 = vperm.xlu0 %686, %v412_v1   ;;  %379 = vmatpush.msra.mxu0 %v359_v5  ;;  %v358_v6 = vld [vmem:[%s336_s14] sm:$0xff]  ;;  %v414_v10 = vand.u32 127, %v413_v9  ;;  %s813_s29 = smov [#allocation6]   ;;  %s513_s9 = sshll.u32 %s934_s6, 4  ;;  %s514_s9 = int_to_ptr.hbm [resolvable:$true] %s513_s9 }
  0x1e   : > { %v355_v7 = vld [vmem:[%s931_s3] sm:$0xff]  ;;  %623 = vmatmul.msk.f32.vlgmr.msra.gmra.mxu0 %vm360_vm2, %v358_v6  ;;  %406 = vmatpush.msra.mxu1 %v356_v4  ;;  %s511_s30 = sshll.u32 %s813_s29, 4  ;;  %s814_s10 = smov [#allocation5]   ;;  %s512_s30 = int_to_ptr.vmem [resolvable:$true] %s511_s30 }
  0x1f   : > { %v354_v8 = vld [vmem:[%s328_s11] sm:$0xff]  ;;  %s498_s11 = sshll.u32 %s814_s10, 4  ;;  %s500_s13 = sshll.u32 %s933_s5, 4  ;;  %s499_s11 = int_to_ptr.vmem [resolvable:$true] %s498_s11  ;;  %s501_s13 = int_to_ptr.hbm [resolvable:$true] %s500_s13 }
  0x20   : > { %407 = vmatpush.msra.mxu1 %v355_v7  ;;  %v421_v27 = vld [vmem:[#allocation5] sm:$0xff] }
  0x21   : > { %625 = vmatmul.msk.f32.vlgmr.msra.gmra.mxu1 %vm384_vm3, %v354_v8  ;;  %v479_v20 = vld [vmem:[#allocation6] sm:$0x1] }
  0x8f   : > { %v417_v11 = vpop.permute.xlu0 %416 }
  0x90   : > { %vm418_vm4 = vcmp.eq.s32.totalorder %v417_v11, %v414_v10 }
  0x91   : > { %v626_v13 = vsel %vm418_vm4, 1.0, %v812_v12 }
  0x92   : > { %422 = vxpose.xlu0.b32.start.end [1/1] (short) (narrow) %v626_v13, 8  ;;  %v480_v14 = vsel %vm360_vm2, %v626_v13, 0.0 }
  0x93   : > { %v481_v15 = vrot.slane %v480_v14, 4 }
  0x95   : > { %v482_v16 = vadd.f32 %v481_v15, %v480_v14 }
  0x97   : > { %v483_v17 = vrot.slane %v482_v16, 2 }
  0x99   : > { %v484_v18 = vadd.f32 %v483_v17, %v482_v16 }
  0x9b   : > { %v485_v19 = vrot.slane %v484_v18, 1  ;;  %v381_v23 = vpop.f32.mrf.mxu0 }
  0x9d   : > { %v486_v21 = vadd.f32 %v485_v19, %v484_v18 }
  0x9e   : > { %v409_v24 = vpop.f32.mrf.mxu1 }
  0x9f   : > { %v487_v22 = vadd.f32 %v486_v21, %v479_v20  ;;  %v410_v25 = vadd.f32 %v409_v24, %v381_v23 }
  0xa1   : > { %489 = vst.msk [vmem:[#allocation6] sm:$0x1] %vm488_vm5, %v487_v22  ;;  %472 = vmatpush.msra.mxu2 %v410_v25 }
  0xa2   : > { %641 = dma.vmem_to_hbm [thread:$0]  (%p897_p9), %s512_s30, 16, %s514_s9, [#allocation7]  }
 0x136   : > { %v438_v26 = vpop.trf.xlu0 }
 0x137   : > { %627 = vmatmul.msk.f32.vlgmr.msra.gmra.mxu2 %vm360_vm2, %v438_v26 }
 0x1ba   : > { %v474_v28 = vpop.f32.mrf.mxu2 }
 0x1bb   : > { %v477_v29 = vadd.f32 %v474_v28, %v421_v27 }
 0x1bd   : > { %478 = vst [vmem:[#allocation5] sm:$0xff] %v477_v29 }
 0x1be   : > { %639 = dma.vmem_to_hbm [thread:$0]  (%p897_p9), %s499_s11, 128, %s501_s13, [#allocation4]  }
 0x1bf   : > { %790 = dma.done.wait (%p897_p9), [#allocation4], 128  }
 0x1c0   : > { %792 = vsyncadd (%p897_p9), [#allocation4], 4294967168 }
 0x1c1   : > { %794 = dma.done.wait (%p897_p9), [#allocation7], 16  }
 0x1c2   : > { %796 = vsyncadd (%p897_p9), [#allocation7], 4294967280 }
 0x1c3 PF: > { %s20_s23 = sadd.s32 1, %s807_s23   ;;  %s936_s21 = smov %s803_s22 }
 0x1c4   : > { %p17_p10 = scmp.ge.s32.totalorder %s20_s23, 4   ;;  %s937_s22 = smov %s939_s25 }
 0x1c6   :  { %19 = sbr.rel (!%p17_p10) target bundleno = 4 (0x4), region = 92 }
 0x1cb   :  { %532 = vsyncpa [#allocation3], 1 }
 0x1cc   :  { %534 = vsyncpa [#allocation3 + $0x1], 1 }
 0x1cd   :  { %535 = vsyncpa [#allocation4], 1 }
 0x1ce   :  { %537 = vsyncpa [#allocation4 + $0x1], 1 }
 0x1cf   :  { %538 = vsyncpa [#allocation7], 1 }

</bundles_post_ra>
